<compile_context>
chip_gen: v5e
topology: v5e:2x2
jax: 0.10.0
libtpu: 0.0.40
codegen_flags: <defaults>
</compile_context>

<pallas_src>
import functools
import math

import jax
import jax.numpy as jnp
from jax.experimental import pallas as pl
from jax.experimental.pallas import tpu as pltpu

PREMLP_TILE = 4096          # D=32 blocks are tiny -> very large row tiles
LINEAR_TILE = 2048          # C=256 blocks
MHSA_TILE = 2048
DW_STRIP_ROWS = 8           # spatial strip height for the depthwise conv
VMEM_LIMIT = 48 * 1024 * 1024   # < v7x 64 MiB physical, > v5e/v6e scoped defaults


def _cparams(*sems):
    return pltpu.CompilerParams(dimension_semantics=sems, vmem_limit_bytes=VMEM_LIMIT)


# ----------------------------------------------------------------------------- helpers
def _round_up(n, m):
    return ((n + m - 1) // m) * m


def _row_tile(n, cap):
    # rows rounded to 16 so both f32 (8,128) and bf16 (16,128) sublane tilings are legal
    return min(cap, _round_up(n, 16))


def _pad_rows(a, n_rows):
    pad = n_rows - a.shape[0]
    if pad == 0:
        return a
    cfg = [(0, pad)] + [(0, 0)] * (a.ndim - 1)
    return jnp.pad(a, cfg)


# ----------------------------------------------------------------------------- kernel 1
def _premlp_score_kernel(inp_ref, w1_ref, b1_ref, w2_ref, b2_ref, w3_ref, b3_ref, out_ref):
    h = jnp.dot(inp_ref[...], w1_ref[...], preferred_element_type=jnp.float32) + b1_ref[...]
    h = jnp.maximum(h, 0.0)
    h = jnp.dot(h, w2_ref[...], preferred_element_type=jnp.float32) + b2_ref[...]
    h = jnp.maximum(h, 0.0)
    # w3_ref is [W3 | W3 @ Ws]: x and scores from one matmul, one wide store.
    out_ref[...] = jnp.dot(h, w3_ref[...], preferred_element_type=jnp.float32) + b3_ref[...]


def premlp_score(inp, p):
    N, D = inp.shape
    DK = p["w3s"].shape[1]
    tile = _row_tile(N, PREMLP_TILE)
    Np = _round_up(N, tile)
    inp_p = _pad_rows(inp, Np)
    out = pl.pallas_call(
        _premlp_score_kernel,
        out_shape=jax.ShapeDtypeStruct((Np, DK), jnp.float32),
        grid=(pl.cdiv(Np, tile),),
        in_specs=[
            pl.BlockSpec((tile, D), lambda i: (i, 0)),
            pl.BlockSpec((D, D), lambda i: (0, 0)),
            pl.BlockSpec((1, D), lambda i: (0, 0)),
            pl.BlockSpec((D, D), lambda i: (0, 0)),
            pl.BlockSpec((1, D), lambda i: (0, 0)),
            pl.BlockSpec((D, DK), lambda i: (0, 0)),
            pl.BlockSpec((1, DK), lambda i: (0, 0)),
        ],
        out_specs=pl.BlockSpec((tile, DK), lambda i: (i, 0)),
        compiler_params=_cparams("parallel"),
    )(inp_p, p["w1"], p["b1"], p["w2"], p["b2"], p["w3s"], p["b3s"])
    return out[:N, :D], out[:N, D:]


# ----------------------------------------------------------------------------- kernel 2
def _dwconv_kernel(x_hbm, w_ref, scale_ref, shift_ref, out_ref, buf, sem,
                   *, TH, W, C, nH):
    b = pl.program_id(0)
    i = pl.program_id(1)
    slot = i % 2

    def fetch(bb, ii, sl):
        pltpu.make_async_copy(
            x_hbm.at[bb, pl.ds(ii * TH, TH + 2)],
            buf.at[sl], sem.at[sl]).start()

    @pl.when(i == 0)                       # prime the first strip of this batch element
    def _():
        fetch(b, i, slot)

    @pl.when(i + 1 < nH)                   # prefetch the next strip into the other slot
    def _():
        fetch(b, i + 1, 1 - slot)

    pltpu.make_async_copy(
        x_hbm.at[b, pl.ds(i * TH, TH + 2)],
        buf.at[slot], sem.at[slot]).wait()

    bv = buf.at[slot]                      # (TH+2, W+2, C) VMEM view
    w_full = w_ref[...]                    # (9, C)
    acc = jnp.zeros((TH, W, C), jnp.float32)
    # TODO(synk): if the +-1 sublane-shifted W slices show up as VMEM copies in the bundle
    # dump, switch to pltpu.roll along the sublane axis (XLU slot is idle here).
    for dh in range(3):
        for dw in range(3):
            idx = dh * 3 + dw
            tap = w_full[idx:idx + 1, :].reshape(1, 1, C)
            acc = acc + bv[dh:dh + TH, dw:dw + W, :].astype(jnp.float32) * tap
    scale = scale_ref[...].reshape(1, 1, C)
    shift = shift_ref[...].reshape(1, 1, C)
    out_ref[0, :, :, :] = jnp.maximum(acc * scale + shift, 0.0).astype(out_ref.dtype)


def _pick_strip(h, cap=DW_STRIP_ROWS):
    for th in range(min(h, cap), 0, -1):
        if h % th == 0:
            return th
    return 1


def dw_conv_bn_relu(x, w9, scale, shift):
    B, H, W, C = x.shape
    TH = _pick_strip(H)
    nH = H // TH
    xp = jnp.pad(x, ((0, 0), (1, 1), (1, 1), (0, 0)))
    kernel = functools.partial(_dwconv_kernel, TH=TH, W=W, C=C, nH=nH)
    return pl.pallas_call(
        kernel,
        out_shape=jax.ShapeDtypeStruct((B, H, W, C), x.dtype),
        grid=(B, nH),
        in_specs=[
            pl.BlockSpec(memory_space=pl.ANY),           # padded BEV stays in HBM
            pl.BlockSpec((9, C), lambda b, i: (0, 0)),
            pl.BlockSpec((1, C), lambda b, i: (0, 0)),
            pl.BlockSpec((1, C), lambda b, i: (0, 0)),
        ],
        out_specs=pl.BlockSpec((1, TH, W, C), lambda b, i: (b, i, 0, 0)),
        scratch_shapes=[
            pltpu.VMEM((2, TH + 2, W + 2, C), x.dtype),  # double-buffered halo strips
            pltpu.SemaphoreType.DMA((2,)),
        ],
        compiler_params=_cparams("parallel", "arbitrary"),
    )(xp, w9, scale, shift)


# ----------------------------------------------------------------------------- kernel 3
def _linear_bias_kernel(x_ref, w_ref, b_ref, out_ref, *, relu):
    y = jnp.dot(x_ref[...], w_ref[...], preferred_element_type=jnp.float32) + b_ref[...]
    if relu:
        y = jnp.maximum(y, 0.0)
    out_ref[...] = y.astype(out_ref.dtype)


def _linear_nobias_kernel(x_ref, w_ref, out_ref, *, relu):
    y = jnp.dot(x_ref[...], w_ref[...], preferred_element_type=jnp.float32)
    if relu:
        y = jnp.maximum(y, 0.0)
    out_ref[...] = y.astype(out_ref.dtype)


def linear_rows(x, w_t, bias=None, relu=False, out_dtype=None):
    N, Din = x.shape
    Dout = w_t.shape[1]
    out_dtype = out_dtype or x.dtype
    tile = _row_tile(N, LINEAR_TILE)
    Np = _round_up(N, tile)
    xp = _pad_rows(x, Np)
    in_specs = [
        pl.BlockSpec((tile, Din), lambda i: (i, 0)),
        pl.BlockSpec((Din, Dout), lambda i: (0, 0)),
    ]
    args = [xp, w_t]
    if bias is not None:
        kernel = functools.partial(_linear_bias_kernel, relu=relu)
        in_specs.append(pl.BlockSpec((1, Dout), lambda i: (0, 0)))
        args.append(bias)
    else:
        kernel = functools.partial(_linear_nobias_kernel, relu=relu)
    out = pl.pallas_call(
        kernel,
        out_shape=jax.ShapeDtypeStruct((Np, Dout), out_dtype),
        grid=(pl.cdiv(Np, tile),),
        in_specs=in_specs,
        out_specs=pl.BlockSpec((tile, Dout), lambda i: (i, 0)),
        compiler_params=_cparams("parallel"),
    )(*args)
    return out[:N]


# ----------------------------------------------------------------------------- kernel 4
def _mhsa_kernel(x_ref, h_ref, ns_ref, nt_ref, wq_ref, bq_ref,
                 wk_ref, bk_ref, wv_ref, bv_ref, lsel_ref, wo_ref, bo_ref,
                 out_ref, *, n_latents, dim):
    K, D = n_latents, dim
    x = x_ref[...]                                                     # (T, D) queries
    hn = h_ref[...].astype(jnp.float32) * ns_ref[...] + nt_ref[...]    # (T, C) folded BN(norm)
    q = jnp.dot(x, wq_ref[...], preferred_element_type=jnp.float32) + bq_ref[...]
    # Batched K/V projections for all K latent slots: one block-diagonal (C,C) matmul each.
    kall = jnp.dot(hn, wk_ref[...], preferred_element_type=jnp.float32) + bk_ref[...]
    vall = jnp.dot(hn, wv_ref[...], preferred_element_type=jnp.float32) + bv_ref[...]
    # Per-head logits (expanded onto head dims, scale folded into lsel) for all slots at once.
    q_rep = jnp.concatenate([q] * K, axis=1)                           # (T, C)
    l_all = jnp.dot(q_rep * kall, lsel_ref[...], preferred_element_type=jnp.float32)
    # Softmax over K latent slots; only m / denom / acc stay live (no per-latent lists).
    m = l_all[:, 0:D]
    for j in range(1, K):
        m = jnp.maximum(m, l_all[:, j * D:(j + 1) * D])
    acc = jnp.zeros_like(q)
    denom = jnp.zeros_like(q)
    for j in range(K):
        e = jnp.exp(l_all[:, j * D:(j + 1) * D] - m)
        denom = denom + e
        acc = acc + e * vall[:, j * D:(j + 1) * D]
    o = acc * pl.reciprocal(denom, approx=True)
    out_ref[...] = jnp.dot(o, wo_ref[...], preferred_element_type=jnp.float32) + bo_ref[...]


def mhsa_latent(x, h, p):
    N, D = x.shape
    C = h.shape[1]
    K = p["k"]
    tile = _row_tile(N, MHSA_TILE)
    Np = _round_up(N, tile)
    xp = _pad_rows(x, Np)
    hp = _pad_rows(h, Np)
    kernel = functools.partial(_mhsa_kernel, n_latents=K, dim=D)
    out = pl.pallas_call(
        kernel,
        out_shape=jax.ShapeDtypeStruct((Np, D), jnp.float32),
        grid=(pl.cdiv(Np, tile),),
        in_specs=[
            pl.BlockSpec((tile, D), lambda i: (i, 0)),     # x (queries)
            pl.BlockSpec((tile, C), lambda i: (i, 0)),     # h in native lane-dense (N, k*dim)
            pl.BlockSpec((1, C), lambda i: (0, 0)),        # folded norm scale (tiled to C)
            pl.BlockSpec((1, C), lambda i: (0, 0)),        # folded norm shift
            pl.BlockSpec((D, D), lambda i: (0, 0)),        # Wq^T
            pl.BlockSpec((1, D), lambda i: (0, 0)),
            pl.BlockSpec((C, C), lambda i: (0, 0)),        # blockdiag(Wk^T)
            pl.BlockSpec((1, C), lambda i: (0, 0)),
            pl.BlockSpec((C, C), lambda i: (0, 0)),        # blockdiag(Wv^T)
            pl.BlockSpec((1, C), lambda i: (0, 0)),
            pl.BlockSpec((C, C), lambda i: (0, 0)),        # blockdiag(scale*head_sum@head_sum^T)
            pl.BlockSpec((D, D), lambda i: (0, 0)),        # Wo^T
            pl.BlockSpec((1, D), lambda i: (0, 0)),
        ],
        out_specs=pl.BlockSpec((tile, D), lambda i: (i, 0)),
        compiler_params=_cparams("parallel"),
    )(xp, hp, p["norm_s_c"], p["norm_t_c"], p["wq"], p["bq"],
      p["wk_bd"], p["bk_c"], p["wv_bd"], p["bv_c"], p["lsel"], p["wo"], p["bo"])
    return out[:N]


# ----------------------------------------------------------------------------- forward
def mlp_vsa_forward(params, inp, inverse, coords, bev_shape, batch_size, num_voxels):
    N, dim = inp.shape
    k = params["k"]
    C = dim * k
    Hh, Ww = int(bev_shape[0]), int(bev_shape[1])

    # 1) pre_mlp + fused score head (Pallas)
    x, scores = premlp_score(inp, params)

    # 2) scatter_softmax + weighted scatter_sum per voxel.
    # TODO(synk): data-dependent segment/scatter ops kept in XLA (no clean Pallas equivalent).
    seg_max = jax.ops.segment_max(scores, inverse, num_segments=num_voxels)
    ex = jnp.exp(scores - seg_max[inverse])
    seg_sum = jax.ops.segment_sum(ex, inverse, num_segments=num_voxels)
    attn = ex / seg_sum[inverse]                                        # (N, k)
    weighted = (attn[:, :, None] * x[:, None, :]).reshape(N, C)
    x_vox = jax.ops.segment_sum(weighted, inverse, num_segments=num_voxels)  # (M, C)

    # 3) dense BEV (channels-last, bf16) == spconv SparseConvTensor(F.relu(x_)).dense()
    flat_idx = (coords[:, 0] * (Hh * Ww) + coords[:, 1] * Ww + coords[:, 2]).astype(jnp.int32)
    dense = jnp.zeros((batch_size * Hh * Ww, C), jnp.bfloat16)
    dense = dense.at[flat_idx].set(jnp.maximum(x_vox, 0.0).astype(jnp.bfloat16))
    dense = dense.reshape(batch_size, Hh, Ww, C)

    # 4) conv_ffn: depthwise3x3+BN+ReLU x2 then 1x1 conv (Pallas; bf16 storage, f32 accumulate)
    h = dw_conv_bn_relu(dense, params["dw1_w"], params["dw1_s"], params["dw1_t"])
    h = dw_conv_bn_relu(h, params["dw2_w"], params["dw2_s"], params["dw2_t"])
    h = linear_rows(h.reshape(-1, C), params["pw_w"], out_dtype=jnp.bfloat16)   # bias-free 1x1

    # 5) gather per-voxel then per-point features (XLA gathers)
    h = h[flat_idx]                                                     # (M, C)
    h = h[inverse]                                                      # (N, C)

    # 6) folded BatchNorm1d + k-latent multi-head attention (Pallas)
    hs = mhsa_latent(x, h, params)                                      # (N, dim)

    return jnp.concatenate([inp, hs], axis=-1)                          # (N, 2*dim)


# ----------------------------------------------------------------------------- test
if __name__ == "__main__":
    dim, k = 32, 8
    C = dim * k
    B, Hh, Ww = 2, 16, 16
    M, N = 48, 192
    num_heads = dim // 4
    head_dim = dim // num_heads

    keys = iter(jax.random.split(jax.random.PRNGKey(0), 64))
    nxt = lambda: next(keys)

    def linear_w(fan_in, fan_out):
        bound = 1.0 / math.sqrt(fan_in)
        w = jax.random.uniform(nxt(), (fan_out, fan_in), jnp.float32, -bound, bound)
        b = jax.random.uniform(nxt(), (fan_out,), jnp.float32, -bound, bound)
        return w, b

    def bn_fold(n, eps):
        gamma = jax.random.uniform(nxt(), (n,), jnp.float32, 0.5, 1.5)
        beta = jax.random.uniform(nxt(), (n,), jnp.float32, -0.5, 0.5)
        mean = 0.1 * jax.random.normal(nxt(), (n,), jnp.float32)
        var = jax.random.uniform(nxt(), (n,), jnp.float32, 0.5, 1.5)
        s = gamma / jnp.sqrt(var + eps)
        return s, beta - mean * s

    def fold_linear_bn(fan_in, fan_out, eps=1e-3):
        w, b = linear_w(fan_in, fan_out)
        s, t = bn_fold(fan_out, eps)
        return w.T * s[None, :], (b * s + t).reshape(1, fan_out)

    w1, b1 = fold_linear_bn(dim, dim)
    w2, b2 = fold_linear_bn(dim, dim)
    w3, b3 = fold_linear_bn(dim, dim)
    ws, bs = linear_w(dim, k)
    # fuse the score head into the last pre_mlp matmul: [W3 | W3@Ws^T], [b3 | b3@Ws^T + bs]
    w3s = jnp.concatenate([w3, w3 @ ws.T], axis=1)                       # (dim, dim+k)
    b3s = jnp.concatenate([b3, b3 @ ws.T + bs.reshape(1, k)], axis=1)    # (1, dim+k)

    def dw_params():
        wc = jax.random.normal(nxt(), (C, 3, 3), jnp.float32) * (1.0 / 3.0)
        w9 = jnp.transpose(wc, (1, 2, 0)).reshape(9, C)
        s, t = bn_fold(C, 1e-5)
        return w9, s.reshape(1, C), t.reshape(1, C)

    dw1_w, dw1_s, dw1_t = dw_params()
    dw2_w, dw2_s, dw2_t = dw_params()
    pw = jax.random.normal(nxt(), (C, C), jnp.float32) * (1.0 / math.sqrt(C))

    norm_s, norm_t = bn_fold(dim, 1e-3)

    wq, bq = linear_w(dim, dim)
    wk_a, bk_a = linear_w(dim, dim)
    wv, bv = linear_w(dim, dim)
    wo, bo = linear_w(dim, dim)
    head_ids = jnp.arange(dim) // head_dim
    head_sum = (head_ids[:, None] == jnp.arange(num_heads)[None, :]).astype(jnp.float32)
    scale = 1.0 / math.sqrt(head_dim)
    eye_k = jnp.eye(k, dtype=jnp.float32)
    # per-head sum + broadcast-back projector with the attention scale folded in,
    # block-diagonalized over the k latent slots (single logits matmul in the kernel).
    lsel = jnp.kron(eye_k, scale * (head_sum @ head_sum.T))

    params = dict(
        dim=dim, k=k, num_heads=num_heads,
        w1=w1, b1=b1, w2=w2, b2=b2, w3s=w3s, b3s=b3s,
        dw1_w=dw1_w, dw1_s=dw1_s, dw1_t=dw1_t,
        dw2_w=dw2_w, dw2_s=dw2_s, dw2_t=dw2_t,
        pw_w=pw.T.astype(jnp.bfloat16),
        norm_s_c=jnp.tile(norm_s.reshape(1, dim), (1, k)),
        norm_t_c=jnp.tile(norm_t.reshape(1, dim), (1, k)),
        wq=wq.T, bq=bq.reshape(1, dim),
        wk_bd=jnp.kron(eye_k, wk_a.T), bk_c=jnp.tile(bk_a.reshape(1, dim), (1, k)),
        wv_bd=jnp.kron(eye_k, wv.T), bv_c=jnp.tile(bv.reshape(1, dim), (1, k)),
        wo=wo.T, bo=bo.reshape(1, dim),
        lsel=lsel,
    )

    # inputs: N points over M unique voxels on a (B, Hh, Ww) BEV grid
    inp = jax.random.normal(nxt(), (N, dim), jnp.float32)
    perm = jax.random.permutation(nxt(), B * Hh * Ww)[:M]
    cb = perm // (Hh * Ww)
    rem = perm % (Hh * Ww)
    coords = jnp.stack([cb, rem // Ww, rem % Ww], axis=1).astype(jnp.int32)
    inverse = jnp.concatenate([
        jnp.arange(M, dtype=jnp.int32),
        jax.random.randint(nxt(), (N - M,), 0, M, dtype=jnp.int32),
    ])

    out = mlp_vsa_forward(params, inp, inverse, coords, (Hh, Ww),
                          batch_size=B, num_voxels=M)
    out = jax.block_until_ready(out)
    assert out.shape == (N, 2 * dim) and out.dtype == jnp.float32
    print("KERNEL_OK")
</pallas_src>

<mosaic_0001>
module attributes {stable_mosaic.version = 11 : i64} {
  func.func @_premlp_score_kernel(%arg0: i32, %arg1: memref<192x32xf32, #tpu.memory_space<vmem>>, %arg2: memref<32x32xf32, #tpu.memory_space<vmem>>, %arg3: memref<1x32xf32, #tpu.memory_space<vmem>>, %arg4: memref<32x32xf32, #tpu.memory_space<vmem>>, %arg5: memref<1x32xf32, #tpu.memory_space<vmem>>, %arg6: memref<32x40xf32, #tpu.memory_space<vmem>>, %arg7: memref<1x40xf32, #tpu.memory_space<vmem>>, %arg8: memref<192x40xf32, #tpu.memory_space<vmem>>) attributes {dimension_semantics = [#tpu.dimension_semantics<parallel>], iteration_bounds = array<i64: 1>, scalar_prefetch = 0 : i64, scratch_operands = 0 : i64, tpu.core_type = #tpu.core_type<tc>, window_params = [{transform_indices = @transform_0, window_bounds = array<i64: 192, 32>}, {pipeline_mode = #tpu.pipeline_mode<synchronous>, transform_indices = @transform_1, window_bounds = array<i64: 32, 32>}, {pipeline_mode = #tpu.pipeline_mode<synchronous>, transform_indices = @transform_2, window_bounds = array<i64: 1, 32>}, {pipeline_mode = #tpu.pipeline_mode<synchronous>, transform_indices = @transform_3, window_bounds = array<i64: 32, 32>}, {pipeline_mode = #tpu.pipeline_mode<synchronous>, transform_indices = @transform_4, window_bounds = array<i64: 1, 32>}, {pipeline_mode = #tpu.pipeline_mode<synchronous>, transform_indices = @transform_5, window_bounds = array<i64: 32, 40>}, {pipeline_mode = #tpu.pipeline_mode<synchronous>, transform_indices = @transform_6, window_bounds = array<i64: 1, 40>}, {transform_indices = @transform_7, window_bounds = array<i64: 192, 40>}]} {
    %c0 = arith.constant 0 : index
    %c0_0 = arith.constant 0 : index
    %0 = vector.load %arg1[%c0, %c0_0] : memref<192x32xf32, #tpu.memory_space<vmem>>, vector<192x32xf32>
    %c0_1 = arith.constant 0 : index
    %c0_2 = arith.constant 0 : index
    %1 = vector.load %arg2[%c0_1, %c0_2] : memref<32x32xf32, #tpu.memory_space<vmem>>, vector<32x32xf32>
    %cst = arith.constant dense<0.000000e+00> : vector<192x32xf32>
    %2 = tpu.matmul %0, %1, %cst {dimension_numbers = #tpu.dot_dimension_numbers<[1], [0], [0], [1], [0, 0, 1, 1], [], []>} : vector<192x32xf32>, vector<32x32xf32>, vector<192x32xf32> -> vector<192x32xf32>
    %c0_3 = arith.constant 0 : index
    %c0_4 = arith.constant 0 : index
    %3 = vector.load %arg3[%c0_3, %c0_4] : memref<1x32xf32, #tpu.memory_space<vmem>>, vector<1x32xf32>
    %4 = vector.broadcast %3 : vector<1x32xf32> to vector<192x32xf32>
    %5 = arith.addf %2, %4 : vector<192x32xf32>
    %cst_5 = arith.constant 0.000000e+00 : f32
    %6 = vector.broadcast %cst_5 : f32 to vector<192x32xf32>
    %7 = arith.maximumf %5, %6 : vector<192x32xf32>
    %c0_6 = arith.constant 0 : index
    %c0_7 = arith.constant 0 : index
    %8 = vector.load %arg4[%c0_6, %c0_7] : memref<32x32xf32, #tpu.memory_space<vmem>>, vector<32x32xf32>
    %cst_8 = arith.constant dense<0.000000e+00> : vector<192x32xf32>
    %9 = tpu.matmul %7, %8, %cst_8 {dimension_numbers = #tpu.dot_dimension_numbers<[1], [0], [0], [1], [0, 0, 1, 1], [], []>} : vector<192x32xf32>, vector<32x32xf32>, vector<192x32xf32> -> vector<192x32xf32>
    %c0_9 = arith.constant 0 : index
    %c0_10 = arith.constant 0 : index
    %10 = vector.load %arg5[%c0_9, %c0_10] : memref<1x32xf32, #tpu.memory_space<vmem>>, vector<1x32xf32>
    %11 = vector.broadcast %10 : vector<1x32xf32> to vector<192x32xf32>
    %12 = arith.addf %9, %11 : vector<192x32xf32>
    %cst_11 = arith.constant 0.000000e+00 : f32
    %13 = vector.broadcast %cst_11 : f32 to vector<192x32xf32>
    %14 = arith.maximumf %12, %13 : vector<192x32xf32>
    %c0_12 = arith.constant 0 : index
    %c0_13 = arith.constant 0 : index
    %15 = vector.load %arg6[%c0_12, %c0_13] : memref<32x40xf32, #tpu.memory_space<vmem>>, vector<32x40xf32>
    %cst_14 = arith.constant dense<0.000000e+00> : vector<192x40xf32>
    %16 = tpu.matmul %14, %15, %cst_14 {dimension_numbers = #tpu.dot_dimension_numbers<[1], [0], [0], [1], [0, 0, 1, 1], [], []>} : vector<192x32xf32>, vector<32x40xf32>, vector<192x40xf32> -> vector<192x40xf32>
    %c0_15 = arith.constant 0 : index
    %c0_16 = arith.constant 0 : index
    %17 = vector.load %arg7[%c0_15, %c0_16] : memref<1x40xf32, #tpu.memory_space<vmem>>, vector<1x40xf32>
    %18 = vector.broadcast %17 : vector<1x40xf32> to vector<192x40xf32>
    %19 = arith.addf %16, %18 : vector<192x40xf32>
    %c0_17 = arith.constant 0 : index
    %c0_18 = arith.constant 0 : index
    %20 = vector.load %arg8[%c0_17, %c0_18] : memref<192x40xf32, #tpu.memory_space<vmem>>, vector<192x40xf32>
    tpu.vector_store %arg8[%c0_17, %c0_18], %19 {strides = array<i32>} : memref<192x40xf32, #tpu.memory_space<vmem>>, vector<192x40xf32>,
    return
  }
  func.func @transform_0(%arg0: i32) -> (i32, i32) {
    %c0_i32 = arith.constant 0 : i32
    %c0_i32_0 = arith.constant 0 : i32
    return %arg0, %c0_i32 : i32, i32
  }
  func.func @transform_1(%arg0: i32) -> (i32, i32) {
    %c0_i32 = arith.constant 0 : i32
    %c0_i32_0 = arith.constant 0 : i32
    %c0_i32_1 = arith.constant 0 : i32
    return %c0_i32, %c0_i32_0 : i32, i32
  }
  func.func @transform_2(%arg0: i32) -> (i32, i32) {
    %c0_i32 = arith.constant 0 : i32
    %c0_i32_0 = arith.constant 0 : i32
    %c0_i32_1 = arith.constant 0 : i32
    return %c0_i32, %c0_i32_0 : i32, i32
  }
  func.func @transform_3(%arg0: i32) -> (i32, i32) {
    %c0_i32 = arith.constant 0 : i32
    %c0_i32_0 = arith.constant 0 : i32
    %c0_i32_1 = arith.constant 0 : i32
    return %c0_i32, %c0_i32_0 : i32, i32
  }
  func.func @transform_4(%arg0: i32) -> (i32, i32) {
    %c0_i32 = arith.constant 0 : i32
    %c0_i32_0 = arith.constant 0 : i32
    %c0_i32_1 = arith.constant 0 : i32
    return %c0_i32, %c0_i32_0 : i32, i32
  }
  func.func @transform_5(%arg0: i32) -> (i32, i32) {
    %c0_i32 = arith.constant 0 : i32
    %c0_i32_0 = arith.constant 0 : i32
    %c0_i32_1 = arith.constant 0 : i32
    return %c0_i32, %c0_i32_0 : i32, i32
  }
  func.func @transform_6(%arg0: i32) -> (i32, i32) {
    %c0_i32 = arith.constant 0 : i32
    %c0_i32_0 = arith.constant 0 : i32
    %c0_i32_1 = arith.constant 0 : i32
    return %c0_i32, %c0_i32_0 : i32, i32
  }
  func.func @transform_7(%arg0: i32) -> (i32, i32) {
    %c0_i32 = arith.constant 0 : i32
    %c0_i32_0 = arith.constant 0 : i32
    return %arg0, %c0_i32 : i32, i32
  }
}

</mosaic_0001>

<bundles_post_ra>
// kernel: tpu_custom_call.1
= control target key start
LH: loop header
LB: loop body
LE: loop exit
PB: predicated region body
PF: predicated region fallthrough
CT: control target
= control target key end

     0   :  { %vm58_vm0 = vcmask 261120   ;;  %vm606_vm1 = vcmask 326656   ;;  %s1125_s1 = inlined_call_operand.vmem [shape: f32[32,32], index: 1, kind: input, shape index: {}]   ;;  %s1126_s0 = inlined_call_operand.vmem [shape: f32[192,32], index: 0, kind: input, shape index: {}]   ;;  %s1127_s2 = inlined_call_operand.vmem [shape: f32[1,32], index: 2, kind: input, shape index: {}]   ;;  %s1128_s3 = inlined_call_operand.vmem [shape: f32[32,32], index: 3, kind: input, shape index: {}]   ;;  %s1129_s4 = inlined_call_operand.vmem [shape: f32[1,32], index: 4, kind: input, shape index: {}]   ;;  %s1130_s5 = inlined_call_operand.vmem [shape: f32[32,40], index: 5, kind: input, shape index: {}]   ;;  %s1131_s6 = inlined_call_operand.vmem [shape: f32[1,40], index: 6, kind: input, shape index: {}]   ;;  %s1132_s7 = inlined_call_operand.vmem [shape: f32[192,40], index: 7, kind: output, shape index: {}]  }
   0x1   :  { %v53_v0 = vld [vmem:[%s1125_s1 + $0x18] sm:$0xff]  ;;  %v52_v1 = vld [vmem:[%s1125_s1 + $0x10] sm:$0xff]  ;;  %v51_v2 = vld [vmem:[%s1125_s1 + $0x8] sm:$0xff] }
   0x2   :  { %143 = vmatpush.msra.mxu0 %v53_v0  ;;  %707 = vmatpush.msra.mxu3 %v53_v0  ;;  %v50_v3 = vld [vmem:[%s1125_s1] sm:$0xff]  ;;  %v27_v5 = vld [vmem:[%s1126_s0 + $0x8] sm:$0xff]  ;;  %v28_v6 = vld [vmem:[%s1126_s0 + $0x10] sm:$0xff] }
   0x3   :  { %v26_v4 = vld [vmem:[%s1126_s0] sm:$0xff]  ;;  %v29_v7 = vld [vmem:[%s1126_s0 + $0x18] sm:$0xff]  ;;  %v31_v9 = vld [vmem:[%s1126_s0 + $0x28] sm:$0xff] }
   0x4   :  { %144 = vmatpush.msra.mxu0 %v52_v1  ;;  %708 = vmatpush.msra.mxu3 %v52_v1  ;;  %v30_v8 = vld [vmem:[%s1126_s0 + $0x20] sm:$0xff]  ;;  %v32_v10 = vld [vmem:[%s1126_s0 + $0x30] sm:$0xff]  ;;  %v33_v12 = vld [vmem:[%s1126_s0 + $0x38] sm:$0xff] }
   0x5   :  { %v44_v11 = vld [vmem:[%s1126_s0 + $0x90] sm:$0xff]  ;;  %v45_v13 = vld [vmem:[%s1126_s0 + $0x98] sm:$0xff]  ;;  %v34_v14 = vld [vmem:[%s1126_s0 + $0x40] sm:$0xff] }
   0x6   :  { %145 = vmatpush.msra.mxu0 %v51_v2  ;;  %709 = vmatpush.msra.mxu3 %v51_v2  ;;  %v46_v15 = vld [vmem:[%s1126_s0 + $0xa0] sm:$0xff]  ;;  %v35_v16 = vld [vmem:[%s1126_s0 + $0x48] sm:$0xff]  ;;  %v36_v18 = vld [vmem:[%s1126_s0 + $0x50] sm:$0xff] }
   0x7   :  { %v47_v17 = vld [vmem:[%s1126_s0 + $0xa8] sm:$0xff]  ;;  %v48_v19 = vld [vmem:[%s1126_s0 + $0xb0] sm:$0xff]  ;;  %v37_v20 = vld [vmem:[%s1126_s0 + $0x58] sm:$0xff] }
   0x8   :  { %146 = vmatpush.msra.mxu0 %v50_v3  ;;  %710 = vmatpush.msra.mxu3 %v50_v3  ;;  %v247_v21 = vld [vmem:[%s1128_s3 + $0x18] sm:$0xff]  ;;  %v246_v23 = vld [vmem:[%s1128_s3 + $0x10] sm:$0xff]  ;;  %v38_v24 = vld [vmem:[%s1126_s0 + $0x60] sm:$0xff] }
   0x9   :  { %635 = vmatmul.msk.f32.vlgmr.msra.gmra.mxu0 %vm58_vm0, %v26_v4  ;;  %653 = vmatmul.msk.f32.vlgmr.msra.gmra.mxu3 %vm58_vm0, %v44_v11  ;;  %v49_v22 = vld [vmem:[%s1126_s0 + $0xb8] sm:$0xff]  ;;  %v245_v25 = vld [vmem:[%s1128_s3 + $0x8] sm:$0xff]  ;;  %v244_v26 = vld [vmem:[%s1128_s3] sm:$0xff] }
   0xa   :  { %336 = vmatpush.msra.mxu1 %v247_v21  ;;  %711 = vmatpush.msrb.mxu3 %v247_v21  ;;  %v39_v27 = vld [vmem:[%s1126_s0 + $0x68] sm:$0xff]  ;;  %v40_v28 = vld [vmem:[%s1126_s0 + $0x70] sm:$0xff]  ;;  %v41_v29 = vld [vmem:[%s1126_s0 + $0x78] sm:$0xff] }
   0xb   :  { %v877_v30 = vld [vmem:[%s1127_s2] ss:$0 sm:$0xff]  ;;  %v43_v36 = vld [vmem:[%s1126_s0 + $0x88] sm:$0xff] }
   0xc   :  { %337 = vmatpush.msra.mxu1 %v246_v23  ;;  %712 = vmatpush.msrb.mxu3 %v246_v23  ;;  %v42_v32 = vld [vmem:[%s1126_s0 + $0x80] sm:$0xff]  ;;  %v439_v23 = vld [vmem:[%s1130_s5 + $0x10] sm:$0xff] }
   0xe   :  { %338 = vmatpush.msra.mxu1 %v245_v25  ;;  %713 = vmatpush.msrb.mxu3 %v245_v25 }
  0x10   :  { %339 = vmatpush.msra.mxu1 %v244_v26  ;;  %714 = vmatpush.msrb.mxu3 %v244_v26 }
  0x11   :  { %636 = vmatmul.msk.f32.gmra.mxu0 %vm58_vm0, %v27_v5  ;;  %654 = vmatmul.msk.f32.gmra.mxu3 %vm58_vm0, %v45_v13 }
  0x19   :  { %637 = vmatmul.msk.f32.gmra.mxu0 %vm58_vm0, %v28_v6  ;;  %655 = vmatmul.msk.f32.gmra.mxu3 %vm58_vm0, %v46_v15 }
  0x21   :  { %638 = vmatmul.msk.f32.gmra.mxu0 %vm58_vm0, %v29_v7  ;;  %656 = vmatmul.msk.f32.gmra.mxu3 %vm58_vm0, %v47_v17 }
  0x29   :  { %639 = vmatmul.msk.f32.gmra.mxu0 %vm58_vm0, %v30_v8  ;;  %657 = vmatmul.msk.f32.gmra.mxu3 %vm58_vm0, %v48_v19 }
  0x31   :  { %640 = vmatmul.msk.f32.gmra.mxu0 %vm58_vm0, %v31_v9  ;;  %658 = vmatmul.msk.f32.gmra.mxu3 %vm58_vm0, %v49_v22 }
  0x39   :  { %641 = vmatmul.msk.f32.gmra.mxu0 %vm58_vm0, %v32_v10 }
  0x41   :  { %642 = vmatmul.msk.f32.gmra.mxu0 %vm58_vm0, %v33_v12 }
  0x49   :  { %643 = vmatmul.msk.f32.gmra.mxu0 %vm58_vm0, %v34_v14 }
  0x51   :  { %644 = vmatmul.msk.f32.gmra.mxu0 %vm58_vm0, %v35_v16 }
  0x59   :  { %645 = vmatmul.msk.f32.gmra.mxu0 %vm58_vm0, %v36_v18 }
  0x61   :  { %646 = vmatmul.msk.f32.gmra.mxu0 %vm58_vm0, %v37_v20  ;;  %v440_v20 = vld [vmem:[%s1130_s5 + $0x18] sm:$0xff] }
  0x62   :  { %529 = vmatpush.msra.mxu2 %v440_v20  ;;  %715 = vmatpush.msra.mxu3 %v440_v20 }
  0x64   :  { %530 = vmatpush.msra.mxu2 %v439_v23  ;;  %716 = vmatpush.msra.mxu3 %v439_v23 }
  0x69   :  { %647 = vmatmul.msk.f32.gmra.mxu0 %vm58_vm0, %v38_v24 }
  0x71   :  { %648 = vmatmul.msk.f32.gmra.mxu0 %vm58_vm0, %v39_v27  ;;  %v438_v27 = vld [vmem:[%s1130_s5 + $0x8] sm:$0xff] }
  0x72   :  { %531 = vmatpush.msra.mxu2 %v438_v27  ;;  %717 = vmatpush.msra.mxu3 %v438_v27 }
  0x79   :  { %649 = vmatmul.msk.f32.gmra.mxu0 %vm58_vm0, %v40_v28 }
  0x81   :  { %650 = vmatmul.msk.f32.gmra.mxu0 %vm58_vm0, %v41_v29  ;;  %v437_v29 = vld [vmem:[%s1130_s5] sm:$0xff] }
  0x82   :  { %532 = vmatpush.msra.mxu2 %v437_v29  ;;  %718 = vmatpush.msra.mxu3 %v437_v29 }
  0x86   :  { %v148_v31 = vpop.f32.mrf.mxu0 }
  0x87   :  { %v149_v33 = vadd.f32 %v877_v30, %v148_v31 }
  0x89   :  { %v220_v34 = vmax.f32 %v149_v33, 0.0  ;;  %651 = vmatmul.msk.f32.gmra.mxu0 %vm58_vm0, %v42_v32 }
  0x8b   :  { %659 = vmatmul.msk.f32.vlgmr.msra.gmra.mxu1 %vm58_vm0, %v220_v34 }
  0x8c   :  { %v202_v56 = vpop.f32.mrf.mxu3 }
  0x8d   :  { %v203_v58 = vadd.f32 %v877_v30, %v202_v56 }
  0x8e   :  { %v151_v35 = vpop.f32.mrf.mxu0 }
  0x8f   :  { %v152_v37 = vadd.f32 %v877_v30, %v151_v35  ;;  %v238_v59 = vmax.f32 %v203_v58, 0.0 }
  0x91   :  { %v221_v38 = vmax.f32 %v152_v37, 0.0  ;;  %652 = vmatmul.msk.f32.gmra.mxu0 %vm58_vm0, %v43_v36  ;;  %677 = vmatmul.msk.f32.vlgmr.msrb.gmra.mxu3 %vm58_vm0, %v238_v59 }
  0x93   :  { %660 = vmatmul.msk.f32.gmra.mxu1 %vm58_vm0, %v221_v38 }
  0x94   :  { %v205_v62 = vpop.f32.mrf.mxu3 }
  0x95   :  { %v206_v0 = vadd.f32 %v877_v30, %v205_v62 }
  0x96   :  { %v154_v39 = vpop.f32.mrf.mxu0 }
  0x97   :  { %v155_v40 = vadd.f32 %v877_v30, %v154_v39  ;;  %v239_v1 = vmax.f32 %v206_v0, 0.0 }
  0x99   :  { %v222_v41 = vmax.f32 %v155_v40, 0.0  ;;  %678 = vmatmul.msk.f32.gmra.mxu3 %vm58_vm0, %v239_v1  ;;  %v946_v40 = vld [vmem:[%s1129_s4] ss:$0 sm:$0xff] }
  0x9b   :  { %661 = vmatmul.msk.f32.gmra.mxu1 %vm58_vm0, %v222_v41 }
  0x9c   :  { %v208_v4 = vpop.f32.mrf.mxu3 }
  0x9d   :  { %v209_v6 = vadd.f32 %v877_v30, %v208_v4 }
  0x9e   :  { %v157_v42 = vpop.f32.mrf.mxu0 }
  0x9f   :  { %v158_v43 = vadd.f32 %v877_v30, %v157_v42  ;;  %v240_v7 = vmax.f32 %v209_v6, 0.0 }
  0xa1   :  { %v223_v44 = vmax.f32 %v158_v43, 0.0  ;;  %679 = vmatmul.msk.f32.gmra.mxu3 %vm58_vm0, %v240_v7 }
  0xa3   :  { %662 = vmatmul.msk.f32.gmra.mxu1 %vm58_vm0, %v223_v44 }
  0xa4   :  { %v211_v10 = vpop.f32.mrf.mxu3 }
  0xa5   :  { %v212_v12 = vadd.f32 %v877_v30, %v211_v10 }
  0xa6   :  { %v160_v45 = vpop.f32.mrf.mxu0 }
  0xa7   :  { %v161_v46 = vadd.f32 %v877_v30, %v160_v45  ;;  %v241_v13 = vmax.f32 %v212_v12, 0.0 }
  0xa9   :  { %v224_v47 = vmax.f32 %v161_v46, 0.0  ;;  %680 = vmatmul.msk.f32.gmra.mxu3 %vm58_vm0, %v241_v13 }
  0xab   :  { %663 = vmatmul.msk.f32.gmra.mxu1 %vm58_vm0, %v224_v47 }
  0xac   :  { %v214_v16 = vpop.f32.mrf.mxu3 }
  0xad   :  { %v215_v18 = vadd.f32 %v877_v30, %v214_v16 }
  0xae   :  { %v163_v48 = vpop.f32.mrf.mxu0 }
  0xaf   :  { %v164_v49 = vadd.f32 %v877_v30, %v163_v48  ;;  %v242_v19 = vmax.f32 %v215_v18, 0.0 }
  0xb1   :  { %v225_v50 = vmax.f32 %v164_v49, 0.0  ;;  %681 = vmatmul.msk.f32.gmra.mxu3 %vm58_vm0, %v242_v19 }
  0xb3   :  { %664 = vmatmul.msk.f32.gmra.mxu1 %vm58_vm0, %v225_v50 }
  0xb4   :  { %v217_v24 = vpop.f32.mrf.mxu3 }
  0xb5   :  { %v218_v26 = vadd.f32 %v877_v30, %v217_v24 }
  0xb6   :  { %v166_v51 = vpop.f32.mrf.mxu0 }
  0xb7   :  { %v167_v52 = vadd.f32 %v877_v30, %v166_v51  ;;  %v243_v28 = vmax.f32 %v218_v26, 0.0 }
  0xb9   :  { %v226_v53 = vmax.f32 %v167_v52, 0.0  ;;  %682 = vmatmul.msk.f32.gmra.mxu3 %vm58_vm0, %v243_v28 }
  0xbb   :  { %665 = vmatmul.msk.f32.gmra.mxu1 %vm58_vm0, %v226_v53 }
  0xbe   :  { %v169_v54 = vpop.f32.mrf.mxu0 }
  0xbf   :  { %v170_v55 = vadd.f32 %v877_v30, %v169_v54 }
  0xc1   :  { %v227_v57 = vmax.f32 %v170_v55, 0.0 }
  0xc3   :  { %666 = vmatmul.msk.f32.gmra.mxu1 %vm58_vm0, %v227_v57 }
  0xc6   :  { %v172_v60 = vpop.f32.mrf.mxu0 }
  0xc7   :  { %v173_v61 = vadd.f32 %v877_v30, %v172_v60 }
  0xc9   :  { %v228_v63 = vmax.f32 %v173_v61, 0.0 }
  0xcb   :  { %667 = vmatmul.msk.f32.gmra.mxu1 %vm58_vm0, %v228_v63 }
  0xce   :  { %v175_v2 = vpop.f32.mrf.mxu0 }
  0xcf   :  { %v176_v3 = vadd.f32 %v877_v30, %v175_v2 }
  0xd1   :  { %v229_v5 = vmax.f32 %v176_v3, 0.0 }
  0xd3   :  { %668 = vmatmul.msk.f32.gmra.mxu1 %vm58_vm0, %v229_v5 }
  0xd6   :  { %v178_v8 = vpop.f32.mrf.mxu0 }
  0xd7   :  { %v179_v9 = vadd.f32 %v877_v30, %v178_v8 }
  0xd9   :  { %v230_v11 = vmax.f32 %v179_v9, 0.0 }
  0xdb   :  { %669 = vmatmul.msk.f32.gmra.mxu1 %vm58_vm0, %v230_v11 }
  0xde   :  { %v181_v14 = vpop.f32.mrf.mxu0 }
  0xdf   :  { %v182_v15 = vadd.f32 %v877_v30, %v181_v14 }
  0xe1   :  { %v231_v17 = vmax.f32 %v182_v15, 0.0 }
  0xe3   :  { %670 = vmatmul.msk.f32.gmra.mxu1 %vm58_vm0, %v231_v17 }
  0xe6   :  { %v184_v21 = vpop.f32.mrf.mxu0 }
  0xe7   :  { %v185_v22 = vadd.f32 %v877_v30, %v184_v21 }
  0xe9   :  { %v232_v25 = vmax.f32 %v185_v22, 0.0 }
  0xeb   :  { %671 = vmatmul.msk.f32.gmra.mxu1 %vm58_vm0, %v232_v25 }
  0xee   :  { %v187_v31 = vpop.f32.mrf.mxu0 }
  0xef   :  { %v188_v32 = vadd.f32 %v877_v30, %v187_v31 }
  0xf1   :  { %v233_v33 = vmax.f32 %v188_v32, 0.0 }
  0xf3   :  { %672 = vmatmul.msk.f32.gmra.mxu1 %vm58_vm0, %v233_v33 }
  0xf6   :  { %v190_v34 = vpop.f32.mrf.mxu0 }
  0xf7   :  { %v191_v35 = vadd.f32 %v877_v30, %v190_v34 }
  0xf9   :  { %v234_v36 = vmax.f32 %v191_v35, 0.0 }
  0xfb   :  { %673 = vmatmul.msk.f32.gmra.mxu1 %vm58_vm0, %v234_v36 }
  0xfe   :  { %v193_v37 = vpop.f32.mrf.mxu0 }
  0xff   :  { %v194_v38 = vadd.f32 %v877_v30, %v193_v37 }
 0x101   :  { %v235_v39 = vmax.f32 %v194_v38, 0.0 }
 0x103   :  { %674 = vmatmul.msk.f32.gmra.mxu1 %vm58_vm0, %v235_v39 }
 0x106   :  { %v196_v41 = vpop.f32.mrf.mxu0 }
 0x107   :  { %v197_v42 = vadd.f32 %v877_v30, %v196_v41 }
 0x108   :  { %v341_v43 = vpop.f32.mrf.mxu1 }
 0x109   :  { %v236_v44 = vmax.f32 %v197_v42, 0.0  ;;  %v342_v45 = vadd.f32 %v946_v40, %v341_v43 }
 0x10b   :  { %v413_v46 = vmax.f32 %v342_v45, 0.0  ;;  %675 = vmatmul.msk.f32.gmra.mxu1 %vm58_vm0, %v236_v44 }
 0x10d   :  { %683 = vmatmul.msk.f32.vlgmr.msra.gmra.mxu2 %vm58_vm0, %v413_v46 }
 0x10e   :  { %v199_v47 = vpop.f32.mrf.mxu0 }
 0x10f   :  { %v200_v48 = vadd.f32 %v877_v30, %v199_v47 }
 0x110   :  { %v344_v49 = vpop.f32.mrf.mxu1 }
 0x111   :  { %v237_v50 = vmax.f32 %v200_v48, 0.0  ;;  %v345_v51 = vadd.f32 %v946_v40, %v344_v49 }
 0x113   :  { %v414_v52 = vmax.f32 %v345_v51, 0.0  ;;  %676 = vmatmul.msk.f32.gmra.mxu1 %vm58_vm0, %v237_v50 }
 0x114   :  { %v395_v7 = vpop.f32.mrf.mxu3 }
 0x115   :  { %684 = vmatmul.msk.f32.gmra.mxu2 %vm58_vm0, %v414_v52  ;;  %v396_v9 = vadd.f32 %v946_v40, %v395_v7 }
 0x117   :  { %v431_v11 = vmax.f32 %v396_v9, 0.0 }
 0x118   :  { %v347_v53 = vpop.f32.mrf.mxu1 }
 0x119   :  { %v348_v54 = vadd.f32 %v946_v40, %v347_v53  ;;  %701 = vmatmul.msk.f32.vlgmr.msra.gmra.mxu3 %vm58_vm0, %v431_v11  ;;  %v1001_v53 = vld [vmem:[%s1131_s6] ss:$0 sm:$0xff] }
 0x11b   :  { %v415_v55 = vmax.f32 %v348_v54, 0.0 }
 0x11c   :  { %v398_v13 = vpop.f32.mrf.mxu3 }
 0x11d   :  { %685 = vmatmul.msk.f32.gmra.mxu2 %vm58_vm0, %v415_v55  ;;  %v399_v15 = vadd.f32 %v946_v40, %v398_v13 }
 0x11f   :  { %v432_v17 = vmax.f32 %v399_v15, 0.0 }
 0x120   :  { %v350_v56 = vpop.f32.mrf.mxu1 }
 0x121   :  { %v351_v57 = vadd.f32 %v946_v40, %v350_v56  ;;  %702 = vmatmul.msk.f32.gmra.mxu3 %vm58_vm0, %v432_v17 }
 0x123   :  { %v416_v58 = vmax.f32 %v351_v57, 0.0 }
 0x124   :  { %v401_v19 = vpop.f32.mrf.mxu3 }
 0x125   :  { %686 = vmatmul.msk.f32.gmra.mxu2 %vm58_vm0, %v416_v58  ;;  %v402_v21 = vadd.f32 %v946_v40, %v401_v19 }
 0x127   :  { %v433_v23 = vmax.f32 %v402_v21, 0.0 }
 0x128   :  { %v353_v30 = vpop.f32.mrf.mxu1 }
 0x129   :  { %v354_v59 = vadd.f32 %v946_v40, %v353_v30  ;;  %703 = vmatmul.msk.f32.gmra.mxu3 %vm58_vm0, %v433_v23 }
 0x12b   :  { %v417_v60 = vmax.f32 %v354_v59, 0.0 }
 0x12c   :  { %v404_v25 = vpop.f32.mrf.mxu3 }
 0x12d   :  { %687 = vmatmul.msk.f32.gmra.mxu2 %vm58_vm0, %v417_v60  ;;  %v405_v27 = vadd.f32 %v946_v40, %v404_v25 }
 0x12f   :  { %v434_v29 = vmax.f32 %v405_v27, 0.0 }
 0x130   :  { %v356_v61 = vpop.f32.mrf.mxu1 }
 0x131   :  { %v357_v62 = vadd.f32 %v946_v40, %v356_v61  ;;  %704 = vmatmul.msk.f32.gmra.mxu3 %vm58_vm0, %v434_v29 }
 0x133   :  { %v418_v63 = vmax.f32 %v357_v62, 0.0 }
 0x134   :  { %v407_v32 = vpop.f32.mrf.mxu3 }
 0x135   :  { %688 = vmatmul.msk.f32.gmra.mxu2 %vm58_vm0, %v418_v63  ;;  %v408_v34 = vadd.f32 %v946_v40, %v407_v32 }
 0x137   :  { %v435_v36 = vmax.f32 %v408_v34, 0.0 }
 0x138   :  { %v359_v0 = vpop.f32.mrf.mxu1 }
 0x139   :  { %v360_v1 = vadd.f32 %v946_v40, %v359_v0  ;;  %705 = vmatmul.msk.f32.gmra.mxu3 %vm58_vm0, %v435_v36 }
 0x13b   :  { %v419_v2 = vmax.f32 %v360_v1, 0.0 }
 0x13c   :  { %v410_v38 = vpop.f32.mrf.mxu3 }
 0x13d   :  { %689 = vmatmul.msk.f32.gmra.mxu2 %vm58_vm0, %v419_v2  ;;  %v411_v41 = vadd.f32 %v946_v40, %v410_v38 }
 0x13f   :  { %v436_v43 = vmax.f32 %v411_v41, 0.0 }
 0x140   :  { %v362_v3 = vpop.f32.mrf.mxu1 }
 0x141   :  { %v363_v4 = vadd.f32 %v946_v40, %v362_v3  ;;  %706 = vmatmul.msk.f32.gmra.mxu3 %vm58_vm0, %v436_v43 }
 0x143   :  { %v420_v5 = vmax.f32 %v363_v4, 0.0 }
 0x145   :  { %690 = vmatmul.msk.f32.gmra.mxu2 %vm58_vm0, %v420_v5 }
 0x148   :  { %v365_v6 = vpop.f32.mrf.mxu1 }
 0x149   :  { %v366_v8 = vadd.f32 %v946_v40, %v365_v6 }
 0x14b   :  { %v421_v10 = vmax.f32 %v366_v8, 0.0 }
 0x14d   :  { %691 = vmatmul.msk.f32.gmra.mxu2 %vm58_vm0, %v421_v10 }
 0x150   :  { %v368_v12 = vpop.f32.mrf.mxu1 }
 0x151   :  { %v369_v14 = vadd.f32 %v946_v40, %v368_v12 }
 0x153   :  { %v422_v16 = vmax.f32 %v369_v14, 0.0 }
 0x155   :  { %692 = vmatmul.msk.f32.gmra.mxu2 %vm58_vm0, %v422_v16 }
 0x158   :  { %v371_v18 = vpop.f32.mrf.mxu1 }
 0x159   :  { %v372_v20 = vadd.f32 %v946_v40, %v371_v18 }
 0x15b   :  { %v423_v22 = vmax.f32 %v372_v20, 0.0 }
 0x15d   :  { %693 = vmatmul.msk.f32.gmra.mxu2 %vm58_vm0, %v423_v22 }
 0x160   :  { %v374_v24 = vpop.f32.mrf.mxu1 }
 0x161   :  { %v375_v26 = vadd.f32 %v946_v40, %v374_v24 }
 0x163   :  { %v424_v28 = vmax.f32 %v375_v26, 0.0 }
 0x165   :  { %694 = vmatmul.msk.f32.gmra.mxu2 %vm58_vm0, %v424_v28 }
 0x168   :  { %v377_v31 = vpop.f32.mrf.mxu1 }
 0x169   :  { %v378_v33 = vadd.f32 %v946_v40, %v377_v31 }
 0x16b   :  { %v425_v35 = vmax.f32 %v378_v33, 0.0 }
 0x16d   :  { %695 = vmatmul.msk.f32.gmra.mxu2 %vm58_vm0, %v425_v35 }
 0x170   :  { %v380_v37 = vpop.f32.mrf.mxu1 }
 0x171   :  { %v381_v39 = vadd.f32 %v946_v40, %v380_v37 }
 0x173   :  { %v426_v42 = vmax.f32 %v381_v39, 0.0 }
 0x175   :  { %696 = vmatmul.msk.f32.gmra.mxu2 %vm58_vm0, %v426_v42 }
 0x178   :  { %v383_v44 = vpop.f32.mrf.mxu1 }
 0x179   :  { %v384_v45 = vadd.f32 %v946_v40, %v383_v44 }
 0x17b   :  { %v427_v46 = vmax.f32 %v384_v45, 0.0 }
 0x17d   :  { %697 = vmatmul.msk.f32.gmra.mxu2 %vm58_vm0, %v427_v46 }
 0x180   :  { %v386_v47 = vpop.f32.mrf.mxu1 }
 0x181   :  { %v387_v48 = vadd.f32 %v946_v40, %v386_v47 }
 0x183   :  { %v428_v49 = vmax.f32 %v387_v48, 0.0 }
 0x185   :  { %698 = vmatmul.msk.f32.gmra.mxu2 %vm58_vm0, %v428_v49 }
 0x188   :  { %v389_v50 = vpop.f32.mrf.mxu1 }
 0x189   :  { %v390_v51 = vadd.f32 %v946_v40, %v389_v50 }
 0x18b   :  { %v429_v52 = vmax.f32 %v390_v51, 0.0 }
 0x18d   :  { %699 = vmatmul.msk.f32.gmra.mxu2 %vm58_vm0, %v429_v52 }
 0x190   :  { %v392_v54 = vpop.f32.mrf.mxu1  ;;  %v534_v55 = vpop.f32.mrf.mxu2 }
 0x191   :  { %v393_v56 = vadd.f32 %v946_v40, %v392_v54  ;;  %v535_v57 = vadd.f32 %v1001_v53, %v534_v55 }
 0x193   :  { %v430_v58 = vmax.f32 %v393_v56, 0.0  ;;  %607 = vst.msk [vmem:[%s1132_s7] sm:$0xff] %vm606_vm1, %v535_v57 }
 0x195   :  { %700 = vmatmul.msk.f32.gmra.mxu2 %vm58_vm0, %v430_v58 }
 0x198   :  { %v537_v30 = vpop.f32.mrf.mxu2 }
 0x199   :  { %v538_v59 = vadd.f32 %v1001_v53, %v537_v30 }
 0x19b   :  { %608 = vst.msk [vmem:[%s1132_s7 + $0x8] sm:$0xff] %vm606_vm1, %v538_v59 }
 0x19c   :  { %v588_v8 = vpop.f32.mrf.mxu3 }
 0x19d   :  { %v589_v10 = vadd.f32 %v1001_v53, %v588_v8 }
 0x19f   :  { %625 = vst.msk [vmem:[%s1132_s7 + $0x90] sm:$0xff] %vm606_vm1, %v589_v10 }
 0x1a0   :  { %v540_v60 = vpop.f32.mrf.mxu2 }
 0x1a1   :  { %v541_v40 = vadd.f32 %v1001_v53, %v540_v60 }
 0x1a3   :  { %609 = vst.msk [vmem:[%s1132_s7 + $0x10] sm:$0xff] %vm606_vm1, %v541_v40 }
 0x1a4   :  { %v591_v12 = vpop.f32.mrf.mxu3 }
 0x1a5   :  { %v592_v14 = vadd.f32 %v1001_v53, %v591_v12 }
 0x1a7   :  { %626 = vst.msk [vmem:[%s1132_s7 + $0x98] sm:$0xff] %vm606_vm1, %v592_v14 }
 0x1a8   :  { %v543_v61 = vpop.f32.mrf.mxu2 }
 0x1a9   :  { %v544_v62 = vadd.f32 %v1001_v53, %v543_v61 }
 0x1ab   :  { %610 = vst.msk [vmem:[%s1132_s7 + $0x18] sm:$0xff] %vm606_vm1, %v544_v62 }
 0x1ac   :  { %v594_v16 = vpop.f32.mrf.mxu3 }
 0x1ad   :  { %v595_v18 = vadd.f32 %v1001_v53, %v594_v16 }
 0x1af   :  { %627 = vst.msk [vmem:[%s1132_s7 + $0xa0] sm:$0xff] %vm606_vm1, %v595_v18 }
 0x1b0   :  { %v546_v63 = vpop.f32.mrf.mxu2 }
 0x1b1   :  { %v547_v0 = vadd.f32 %v1001_v53, %v546_v63 }
 0x1b3   :  { %611 = vst.msk [vmem:[%s1132_s7 + $0x20] sm:$0xff] %vm606_vm1, %v547_v0 }
 0x1b4   :  { %v597_v20 = vpop.f32.mrf.mxu3 }
 0x1b5   :  { %v598_v22 = vadd.f32 %v1001_v53, %v597_v20 }
 0x1b7   :  { %628 = vst.msk [vmem:[%s1132_s7 + $0xa8] sm:$0xff] %vm606_vm1, %v598_v22 }
 0x1b8   :  { %v549_v1 = vpop.f32.mrf.mxu2 }
 0x1b9   :  { %v550_v2 = vadd.f32 %v1001_v53, %v549_v1 }
 0x1bb   :  { %612 = vst.msk [vmem:[%s1132_s7 + $0x28] sm:$0xff] %vm606_vm1, %v550_v2 }
 0x1bc   :  { %v600_v24 = vpop.f32.mrf.mxu3 }
 0x1bd   :  { %v601_v26 = vadd.f32 %v1001_v53, %v600_v24 }
 0x1bf   :  { %629 = vst.msk [vmem:[%s1132_s7 + $0xb0] sm:$0xff] %vm606_vm1, %v601_v26 }
 0x1c0   :  { %v552_v3 = vpop.f32.mrf.mxu2 }
 0x1c1   :  { %v553_v4 = vadd.f32 %v1001_v53, %v552_v3 }
 0x1c3   :  { %613 = vst.msk [vmem:[%s1132_s7 + $0x30] sm:$0xff] %vm606_vm1, %v553_v4 }
 0x1c4   :  { %v603_v28 = vpop.f32.mrf.mxu3 }
 0x1c5   :  { %v604_v31 = vadd.f32 %v1001_v53, %v603_v28 }
 0x1c7   :  { %630 = vst.msk [vmem:[%s1132_s7 + $0xb8] sm:$0xff] %vm606_vm1, %v604_v31 }
 0x1c8   :  { %v555_v5 = vpop.f32.mrf.mxu2 }
 0x1c9   :  { %v556_v6 = vadd.f32 %v1001_v53, %v555_v5 }
 0x1cb   :  { %614 = vst.msk [vmem:[%s1132_s7 + $0x38] sm:$0xff] %vm606_vm1, %v556_v6 }
 0x1d0   :  { %v558_v7 = vpop.f32.mrf.mxu2 }
 0x1d1   :  { %v559_v9 = vadd.f32 %v1001_v53, %v558_v7 }
 0x1d3   :  { %615 = vst.msk [vmem:[%s1132_s7 + $0x40] sm:$0xff] %vm606_vm1, %v559_v9 }
 0x1d8   :  { %v561_v11 = vpop.f32.mrf.mxu2 }
 0x1d9   :  { %v562_v13 = vadd.f32 %v1001_v53, %v561_v11 }
 0x1db   :  { %616 = vst.msk [vmem:[%s1132_s7 + $0x48] sm:$0xff] %vm606_vm1, %v562_v13 }
 0x1e0   :  { %v564_v15 = vpop.f32.mrf.mxu2 }
 0x1e1   :  { %v565_v17 = vadd.f32 %v1001_v53, %v564_v15 }
 0x1e3   :  { %617 = vst.msk [vmem:[%s1132_s7 + $0x50] sm:$0xff] %vm606_vm1, %v565_v17 }
 0x1e8   :  { %v567_v19 = vpop.f32.mrf.mxu2 }
 0x1e9   :  { %v568_v21 = vadd.f32 %v1001_v53, %v567_v19 }
 0x1eb   :  { %618 = vst.msk [vmem:[%s1132_s7 + $0x58] sm:$0xff] %vm606_vm1, %v568_v21 }
 0x1f0   :  { %v570_v23 = vpop.f32.mrf.mxu2 }
 0x1f1   :  { %v571_v25 = vadd.f32 %v1001_v53, %v570_v23 }
 0x1f3   :  { %619 = vst.msk [vmem:[%s1132_s7 + $0x60] sm:$0xff] %vm606_vm1, %v571_v25 }
 0x1f8   :  { %v573_v27 = vpop.f32.mrf.mxu2 }
 0x1f9   :  { %v574_v29 = vadd.f32 %v1001_v53, %v573_v27 }
 0x1fb   :  { %620 = vst.msk [vmem:[%s1132_s7 + $0x68] sm:$0xff] %vm606_vm1, %v574_v29 }
 0x200   :  { %v576_v32 = vpop.f32.mrf.mxu2 }
 0x201   :  { %v577_v33 = vadd.f32 %v1001_v53, %v576_v32 }
 0x203   :  { %621 = vst.msk [vmem:[%s1132_s7 + $0x70] sm:$0xff] %vm606_vm1, %v577_v33 }
 0x208   :  { %v579_v34 = vpop.f32.mrf.mxu2 }
 0x209   :  { %v580_v35 = vadd.f32 %v1001_v53, %v579_v34 }
 0x20b   :  { %622 = vst.msk [vmem:[%s1132_s7 + $0x78] sm:$0xff] %vm606_vm1, %v580_v35 }
 0x210   :  { %v582_v36 = vpop.f32.mrf.mxu2 }
 0x211   :  { %v583_v37 = vadd.f32 %v1001_v53, %v582_v36 }
 0x213   :  { %623 = vst.msk [vmem:[%s1132_s7 + $0x80] sm:$0xff] %vm606_vm1, %v583_v37 }
 0x218   :  { %v585_v38 = vpop.f32.mrf.mxu2 }
 0x219   :  { %v586_v39 = vadd.f32 %v1001_v53, %v585_v38 }
 0x21b   :  { %624 = vst.msk [vmem:[%s1132_s7 + $0x88] sm:$0xff] %vm606_vm1, %v586_v39 }

</bundles_post_ra>
